<compile_context>
chip_gen: v7x
topology: tpu7x:2x2x1
jax: 0.10.0
libtpu: 0.0.40
codegen_flags: <defaults>
</compile_context>

<pallas_src>
import functools

import jax
import jax.numpy as jnp
from jax import lax
from jax.experimental import pallas as pl
from jax.experimental.pallas import tpu as pltpu

_LANES = 128
_SUBLANES = 8


def _round_up(x, m):
    return ((x + m - 1) // m) * m


def _make_kernel(*, blocks_per_split, total_blocks, block_rows, chunk_rows,
                 valid_rows_last):
    """Builds the kernel body with all tiling decisions baked in statically."""
    num_chunks = block_rows // chunk_rows
    full_chunks_last = valid_rows_last // chunk_rows
    rem_rows_last = valid_rows_last - full_chunks_last * chunk_rows
    has_partial = valid_rows_last != block_rows

    def kernel(shift_ref, yp_ref, yt_ref, out_ref):
        s = pl.program_id(0)          # split (parallel; one per TC on v7x)
        j = pl.program_id(1)          # row-block within the split (arbitrary)
        g = s * blocks_per_split + j  # global row-block index

        @pl.when(j == 0)
        def _init():
            out_ref[...] = jnp.zeros_like(out_ref)

        a = shift_ref[0]
        b = shift_ref[1]
        # Hoisted loop-invariant shift tiles (avoid a broadcast per chunk).
        a_tile = jnp.full((chunk_rows, _LANES), a, dtype=jnp.float32)
        b_tile = jnp.full((chunk_rows, _LANES), b, dtype=jnp.float32)

        def reduce_rows(v):
            # (r, 128) -> (r//8, 8, 128) -> sum over leading axis: pure
            # cross-vreg VALU adds, no XLU work in the streaming loop.
            r = v.shape[0]
            return jnp.sum(v.reshape(r // _SUBLANES, _SUBLANES, _LANES), axis=0)

        def block_sums(n_chunks):
            # Fused single pass: 2 vld, 2 sub, 3 mul, 5 add per f32 vreg-pair,
            # zero stores inside the loop.
            def body(c, carry):
                sx, sy, sxx, syy, sxy = carry
                off = pl.multiple_of(c * chunk_rows, chunk_rows)
                xp = yp_ref[pl.ds(off, chunk_rows), :].astype(jnp.float32) - a_tile
                xt = yt_ref[pl.ds(off, chunk_rows), :].astype(jnp.float32) - b_tile
                return (sx + reduce_rows(xp),
                        sy + reduce_rows(xt),
                        sxx + reduce_rows(xp * xp),
                        syy + reduce_rows(xt * xt),
                        sxy + reduce_rows(xp * xt))

            z = jnp.zeros((_SUBLANES, _LANES), jnp.float32)
            init = (z, z, z, z, z)
            if n_chunks == 0:
                return init
            return lax.fori_loop(0, n_chunks, body, init,
                                 unroll=max(1, min(8, n_chunks)))

        def flush(sums):
            for i in range(5):
                out_ref[i] += sums[i]

        if has_partial:
            # All blocks except the (statically known) ragged border block.
            @pl.when(g < total_blocks - 1)
            def _full_blocks():
                flush(block_sums(num_chunks))

            # Ragged border block: only statically-sized, fully valid slices
            # are ever read (no garbage rows, no masks).
            @pl.when(g == total_blocks - 1)
            def _partial_block():
                sums = block_sums(full_chunks_last)
                if rem_rows_last:
                    off = full_chunks_last * chunk_rows
                    xp = (yp_ref[pl.ds(off, rem_rows_last), :].astype(jnp.float32)
                          - a_tile[:rem_rows_last])
                    xt = (yt_ref[pl.ds(off, rem_rows_last), :].astype(jnp.float32)
                          - b_tile[:rem_rows_last])
                    sums = (sums[0] + reduce_rows(xp),
                            sums[1] + reduce_rows(xt),
                            sums[2] + reduce_rows(xp * xp),
                            sums[3] + reduce_rows(xt * xt),
                            sums[4] + reduce_rows(xp * xt))
                flush(sums)
        else:
            # Guard still needed: when the block count is odd the extra grid
            # point of the second split is clamped to the last block and must
            # be skipped to avoid double counting.
            @pl.when(g < total_blocks)
            def _full_blocks():
                flush(block_sums(num_chunks))

    return kernel


@functools.partial(jax.jit, static_argnames=("block_rows",))
def ic_loss(y_pred, y_true, block_rows=None):
    yp = jnp.ravel(y_pred)  # keep native dtype in HBM; upcast per chunk in-kernel
    yt = jnp.ravel(y_true)
    n = yp.shape[0]

    # Cheap shift (snapped to the input dtype so pad elements contribute an
    # exact zero after shifting) — removes one-pass cancellation risk.
    k = min(n, 1024)
    a_native = jnp.mean(yp[:k].astype(jnp.float32)).astype(yp.dtype)
    b_native = jnp.mean(yt[:k].astype(jnp.float32)).astype(yt.dtype)
    shifts = jnp.stack([a_native.astype(jnp.float32),
                        b_native.astype(jnp.float32)])

    # Lane-dense (rows, 128) slab; pad only to a multiple of 8 rows (<= 1023
    # elements, and only when n doesn't already tile) — never to a block
    # multiple, so no large HBM copy for ragged sizes.
    rows = _round_up(-(-n // _LANES), _SUBLANES)
    padded_len = rows * _LANES

    itemsize = max(jnp.dtype(yp.dtype).itemsize, jnp.dtype(yt.dtype).itemsize)
    if block_rows is None:
        # ~4 MiB per input per pipeline buffer (8192 rows f32 / 16384 bf16).
        block_rows = (4 << 20) // (_LANES * itemsize)
    block_rows = max(_SUBLANES, min(block_rows, (11 << 20) // (_LANES * itemsize)))
    br = _round_up(min(block_rows, rows), _SUBLANES)
    chunk_rows = next(c for c in (32, 16, 8) if br % c == 0)

    total_blocks = -(-rows // br)
    splits = 2 if total_blocks >= 2 else 1       # both TensorCores on v7x
    blocks_per_split = -(-total_blocks // splits)
    valid_rows_last = rows - (total_blocks - 1) * br

    def as_slab(v, fill):
        pad = padded_len - v.shape[0]
        if pad:
            v = jnp.pad(v, (0, pad), constant_values=fill)
        return v.reshape(rows, _LANES)

    yp2 = as_slab(yp, a_native)
    yt2 = as_slab(yt, b_native)

    # Double-buffered inputs dominate VMEM; no large in-kernel temporaries
    # remain after the fused loop.  Cap at 48 MiB (headroom below v7x's 64 MiB
    # physical VMEM).  (Could be sized per-chip via pltpu.get_tpu_info().)
    block_bytes = br * _LANES * itemsize
    vmem_limit = int(min(max(4 * block_bytes + (2 << 20), 16 << 20), 48 << 20))

    kernel = _make_kernel(
        blocks_per_split=blocks_per_split,
        total_blocks=total_blocks,
        block_rows=br,
        chunk_rows=chunk_rows,
        valid_rows_last=valid_rows_last,
    )

    def in_map(s, j, shifts_ref):
        # Clamp the (at most one) out-of-range grid point of the second split;
        # its compute is skipped in-kernel.
        return (jnp.minimum(s * blocks_per_split + j, total_blocks - 1), 0)

    grid_spec = pltpu.PrefetchScalarGridSpec(
        num_scalar_prefetch=1,
        grid=(splits, blocks_per_split),
        in_specs=[
            pl.BlockSpec((br, _LANES), in_map),
            pl.BlockSpec((br, _LANES), in_map),
        ],
        # Per-split partial sums; the output block is resident across the
        # "arbitrary" axis and acts as the accumulator (no scratch needed).
        out_specs=pl.BlockSpec((5, _SUBLANES, _LANES),
                               lambda s, j, shifts_ref: (s, 0, 0)),
    )

    partial_sums = pl.pallas_call(
        kernel,
        out_shape=jax.ShapeDtypeStruct((splits * 5, _SUBLANES, _LANES),
                                       jnp.float32),
        grid_spec=grid_spec,
        compiler_params=pltpu.CompilerParams(
            dimension_semantics=("parallel", "arbitrary"),
            vmem_limit_bytes=vmem_limit,
        ),
        cost_estimate=pl.CostEstimate(
            flops=10 * rows * _LANES,
            transcendentals=0,
            bytes_accessed=(yp2.size * yp2.dtype.itemsize
                            + yt2.size * yt2.dtype.itemsize
                            + splits * 5 * _SUBLANES * _LANES * 4),
        ),
    )(shifts, yp2, yt2)

    # Tiny combine + sqrt/divide epilogue in plain JAX.
    stats = jnp.sum(partial_sums.reshape(splits, 5, _SUBLANES * _LANES),
                    axis=(0, 2))
    sx, sy, sxx, syy, sxy = stats[0], stats[1], stats[2], stats[3], stats[4]
    nf = jnp.float32(n)
    num = sxy - sx * sy / nf
    var_x = jnp.maximum(sxx - sx * sx / nf, 0.0)
    var_y = jnp.maximum(syy - sy * sy / nf, 0.0)
    ic = num / (jnp.sqrt(var_x * var_y) + 1e-8)
    return -ic


def _reference_ic_loss(y_pred, y_true):
    yp = jnp.ravel(y_pred).astype(jnp.float32)
    yt = jnp.ravel(y_true).astype(jnp.float32)
    dp = yp - jnp.mean(yp)
    dt = yt - jnp.mean(yt)
    num = jnp.sum(dp * dt)
    den = jnp.sqrt(jnp.sum(dp * dp) * jnp.sum(dt * dt))
    return -(num / (den + 1e-8))


if __name__ == "__main__":
    key = jax.random.PRNGKey(0)
    k1, k2, k3 = jax.random.split(key, 3)

    # Small (batch, channels, H, W) prediction, f32.
    y_pred = jax.random.normal(k1, (2, 4, 16, 16), dtype=jnp.float32)
    y_true = 0.7 * y_pred + 0.3 * jax.random.normal(k2, (2, 4, 16, 16),
                                                    dtype=jnp.float32)
    loss = ic_loss(y_pred, y_true)
    jax.block_until_ready(loss)
    ref = _reference_ic_loss(y_pred, y_true)
    assert jnp.allclose(loss, ref, atol=1e-4, rtol=1e-4), (loss, ref)

    # Ragged size, non-zero mean, forced small blocks: exercises the minimal
    # wrapper pad, the in-kernel ragged border block, the clamped extra grid
    # point and the 2-way split.
    yp2 = jax.random.normal(k3, (2, 4, 32, 33), dtype=jnp.float32) + 3.0
    yt2 = 0.5 * yp2 + 0.5 * jax.random.normal(k1, (2, 4, 32, 33),
                                              dtype=jnp.float32)
    loss2 = ic_loss(yp2, yt2, block_rows=16)
    jax.block_until_ready(loss2)
    ref2 = _reference_ic_loss(yp2, yt2)
    assert jnp.allclose(loss2, ref2, atol=1e-4, rtol=1e-4), (loss2, ref2)

    # bf16 inputs (native-dtype HBM reads, per-chunk upcast in-kernel).
    loss3 = ic_loss(y_pred.astype(jnp.bfloat16), y_true.astype(jnp.bfloat16))
    jax.block_until_ready(loss3)
    ref3 = _reference_ic_loss(y_pred.astype(jnp.bfloat16),
                              y_true.astype(jnp.bfloat16))
    assert jnp.allclose(loss3, ref3, atol=2e-3, rtol=2e-3), (loss3, ref3)

    print("KERNEL_OK")
</pallas_src>

<mosaic_0001>
module attributes {stable_mosaic.version = 11 : i64} {
  func.func @kernel(%arg0: i32, %arg1: i32, %arg2: memref<2xf32, #tpu.memory_space<smem>>, %arg3: memref<16x128xf32, #tpu.memory_space<vmem>>, %arg4: memref<16x128xf32, #tpu.memory_space<vmem>>, %arg5: memref<5x8x128xf32, #tpu.memory_space<vmem>>) attributes {dimension_semantics = [#tpu.dimension_semantics<parallel>, #tpu.dimension_semantics<arbitrary>], iteration_bounds = array<i64: 1, 1>, scalar_prefetch = 1 : i64, scratch_operands = 0 : i64, tpu.core_type = #tpu.core_type<tc>, window_params = [{transform_indices = @transform_0, window_bounds = array<i64: 16, 128>}, {transform_indices = @transform_1, window_bounds = array<i64: 16, 128>}, {transform_indices = @transform_2, window_bounds = array<i64: 5, 8, 128>}]} {
    %c1_i32 = arith.constant 1 : i32
    %0 = arith.muli %arg0, %c1_i32 : i32
    %1 = arith.addi %0, %arg1 : i32
    %c0_i32 = arith.constant 0 : i32
    %2 = arith.cmpi eq, %arg1, %c0_i32 : i32
    %3 = arith.extui %2 : i1 to i32
    %c0_i32_0 = arith.constant 0 : i32
    %4 = arith.cmpi ne, %3, %c0_i32_0 : i32
    scf.if %4 {
      %cst = arith.constant 0.000000e+00 : f32
      %12 = vector.broadcast %cst : f32 to vector<5x8x128xf32>
      %c0_3 = arith.constant 0 : index
      %c0_4 = arith.constant 0 : index
      %c0_5 = arith.constant 0 : index
      %13 = vector.load %arg5[%c0_3, %c0_4, %c0_5] : memref<5x8x128xf32, #tpu.memory_space<vmem>>, vector<5x8x128xf32>
      tpu.vector_store %arg5[%c0_3, %c0_4, %c0_5], %12 {strides = array<i32>} : memref<5x8x128xf32, #tpu.memory_space<vmem>>, vector<5x8x128xf32>,
    } else {
    }
    %c0 = arith.constant 0 : index
    %5 = memref.load %arg2[%c0] : memref<2xf32, #tpu.memory_space<smem>>
    %c1 = arith.constant 1 : index
    %6 = memref.load %arg2[%c1] : memref<2xf32, #tpu.memory_space<smem>>
    %7 = vector.broadcast %5 : f32 to vector<16x128xf32>
    %8 = vector.broadcast %6 : f32 to vector<16x128xf32>
    %c1_i32_1 = arith.constant 1 : i32
    %9 = arith.cmpi slt, %1, %c1_i32_1 : i32
    %10 = arith.extui %9 : i1 to i32
    %c0_i32_2 = arith.constant 0 : i32
    %11 = arith.cmpi ne, %10, %c0_i32_2 : i32
    scf.if %11 {
      %cst = arith.constant 0.000000e+00 : f32
      %12 = vector.broadcast %cst : f32 to vector<8x128xf32>
      %c0_i32_3 = arith.constant 0 : i32
      %c16_i32 = arith.constant 16 : i32
      %13 = arith.muli %c0_i32_3, %c16_i32 : i32
      %14 = tpu.assume_multiple %13, 16 : i32
      %15 = arith.index_cast %14 : i32 to index
      %c0_4 = arith.constant 0 : index
      %16 = vector.load %arg3[%15, %c0_4] : memref<16x128xf32, #tpu.memory_space<vmem>>, vector<16x128xf32>
      %17 = arith.subf %16, %7 : vector<16x128xf32>
      %18 = arith.index_cast %14 : i32 to index
      %c0_5 = arith.constant 0 : index
      %19 = vector.load %arg4[%18, %c0_5] : memref<16x128xf32, #tpu.memory_space<vmem>>, vector<16x128xf32>
      %20 = arith.subf %19, %8 : vector<16x128xf32>
      %21 = vector.shape_cast %17 : vector<16x128xf32> to vector<2x8x128xf32>
      %cst_6 = arith.constant dense<0.000000e+00> : vector<8x128xf32>
      %22 = vector.multi_reduction <add>, %21, %cst_6 [0] : vector<2x8x128xf32> to vector<8x128xf32>
      %23 = arith.addf %12, %22 : vector<8x128xf32>
      %24 = vector.shape_cast %20 : vector<16x128xf32> to vector<2x8x128xf32>
      %cst_7 = arith.constant dense<0.000000e+00> : vector<8x128xf32>
      %25 = vector.multi_reduction <add>, %24, %cst_7 [0] : vector<2x8x128xf32> to vector<8x128xf32>
      %26 = arith.addf %12, %25 : vector<8x128xf32>
      %27 = arith.mulf %17, %17 : vector<16x128xf32>
      %28 = vector.shape_cast %27 : vector<16x128xf32> to vector<2x8x128xf32>
      %cst_8 = arith.constant dense<0.000000e+00> : vector<8x128xf32>
      %29 = vector.multi_reduction <add>, %28, %cst_8 [0] : vector<2x8x128xf32> to vector<8x128xf32>
      %30 = arith.addf %12, %29 : vector<8x128xf32>
      %31 = arith.mulf %20, %20 : vector<16x128xf32>
      %32 = vector.shape_cast %31 : vector<16x128xf32> to vector<2x8x128xf32>
      %cst_9 = arith.constant dense<0.000000e+00> : vector<8x128xf32>
      %33 = vector.multi_reduction <add>, %32, %cst_9 [0] : vector<2x8x128xf32> to vector<8x128xf32>
      %34 = arith.addf %12, %33 : vector<8x128xf32>
      %35 = arith.mulf %17, %20 : vector<16x128xf32>
      %36 = vector.shape_cast %35 : vector<16x128xf32> to vector<2x8x128xf32>
      %cst_10 = arith.constant dense<0.000000e+00> : vector<8x128xf32>
      %37 = vector.multi_reduction <add>, %36, %cst_10 [0] : vector<2x8x128xf32> to vector<8x128xf32>
      %38 = arith.addf %12, %37 : vector<8x128xf32>
      %c1_i32_11 = arith.constant 1 : i32
      %c0_12 = arith.constant 0 : index
      %c0_13 = arith.constant 0 : index
      %c0_14 = arith.constant 0 : index
      %39 = vector.load %arg5[%c0_12, %c0_13, %c0_14] : memref<5x8x128xf32, #tpu.memory_space<vmem>>, vector<1x8x128xf32>
      %40 = vector.shape_cast %39 : vector<1x8x128xf32> to vector<8x128xf32>
      %41 = arith.addf %40, %23 : vector<8x128xf32>
      %c0_15 = arith.constant 0 : index
      %c0_16 = arith.constant 0 : index
      %c0_17 = arith.constant 0 : index
      %42 = vector.load %arg5[%c0_15, %c0_16, %c0_17] : memref<5x8x128xf32, #tpu.memory_space<vmem>>, vector<1x8x128xf32>
      %43 = vector.shape_cast %42 : vector<1x8x128xf32> to vector<8x128xf32>
      %44 = vector.shape_cast %41 : vector<8x128xf32> to vector<1x8x128xf32>
      tpu.vector_store %arg5[%c0_15, %c0_16, %c0_17], %44 {strides = array<i32>} : memref<5x8x128xf32, #tpu.memory_space<vmem>>, vector<1x8x128xf32>,
      %c1_18 = arith.constant 1 : index
      %c0_19 = arith.constant 0 : index
      %c0_20 = arith.constant 0 : index
      %45 = vector.load %arg5[%c1_18, %c0_19, %c0_20] : memref<5x8x128xf32, #tpu.memory_space<vmem>>, vector<1x8x128xf32>
      %46 = vector.shape_cast %45 : vector<1x8x128xf32> to vector<8x128xf32>
      %47 = arith.addf %46, %26 : vector<8x128xf32>
      %c1_21 = arith.constant 1 : index
      %c0_22 = arith.constant 0 : index
      %c0_23 = arith.constant 0 : index
      %48 = vector.load %arg5[%c1_21, %c0_22, %c0_23] : memref<5x8x128xf32, #tpu.memory_space<vmem>>, vector<1x8x128xf32>
      %49 = vector.shape_cast %48 : vector<1x8x128xf32> to vector<8x128xf32>
      %50 = vector.shape_cast %47 : vector<8x128xf32> to vector<1x8x128xf32>
      tpu.vector_store %arg5[%c1_21, %c0_22, %c0_23], %50 {strides = array<i32>} : memref<5x8x128xf32, #tpu.memory_space<vmem>>, vector<1x8x128xf32>,
      %c2 = arith.constant 2 : index
      %c0_24 = arith.constant 0 : index
      %c0_25 = arith.constant 0 : index
      %51 = vector.load %arg5[%c2, %c0_24, %c0_25] : memref<5x8x128xf32, #tpu.memory_space<vmem>>, vector<1x8x128xf32>
      %52 = vector.shape_cast %51 : vector<1x8x128xf32> to vector<8x128xf32>
      %53 = arith.addf %52, %30 : vector<8x128xf32>
      %c2_26 = arith.constant 2 : index
      %c0_27 = arith.constant 0 : index
      %c0_28 = arith.constant 0 : index
      %54 = vector.load %arg5[%c2_26, %c0_27, %c0_28] : memref<5x8x128xf32, #tpu.memory_space<vmem>>, vector<1x8x128xf32>
      %55 = vector.shape_cast %54 : vector<1x8x128xf32> to vector<8x128xf32>
      %56 = vector.shape_cast %53 : vector<8x128xf32> to vector<1x8x128xf32>
      tpu.vector_store %arg5[%c2_26, %c0_27, %c0_28], %56 {strides = array<i32>} : memref<5x8x128xf32, #tpu.memory_space<vmem>>, vector<1x8x128xf32>,
      %c3 = arith.constant 3 : index
      %c0_29 = arith.constant 0 : index
      %c0_30 = arith.constant 0 : index
      %57 = vector.load %arg5[%c3, %c0_29, %c0_30] : memref<5x8x128xf32, #tpu.memory_space<vmem>>, vector<1x8x128xf32>
      %58 = vector.shape_cast %57 : vector<1x8x128xf32> to vector<8x128xf32>
      %59 = arith.addf %58, %34 : vector<8x128xf32>
      %c3_31 = arith.constant 3 : index
      %c0_32 = arith.constant 0 : index
      %c0_33 = arith.constant 0 : index
      %60 = vector.load %arg5[%c3_31, %c0_32, %c0_33] : memref<5x8x128xf32, #tpu.memory_space<vmem>>, vector<1x8x128xf32>
      %61 = vector.shape_cast %60 : vector<1x8x128xf32> to vector<8x128xf32>
      %62 = vector.shape_cast %59 : vector<8x128xf32> to vector<1x8x128xf32>
      tpu.vector_store %arg5[%c3_31, %c0_32, %c0_33], %62 {strides = array<i32>} : memref<5x8x128xf32, #tpu.memory_space<vmem>>, vector<1x8x128xf32>,
      %c4 = arith.constant 4 : index
      %c0_34 = arith.constant 0 : index
      %c0_35 = arith.constant 0 : index
      %63 = vector.load %arg5[%c4, %c0_34, %c0_35] : memref<5x8x128xf32, #tpu.memory_space<vmem>>, vector<1x8x128xf32>
      %64 = vector.shape_cast %63 : vector<1x8x128xf32> to vector<8x128xf32>
      %65 = arith.addf %64, %38 : vector<8x128xf32>
      %c4_36 = arith.constant 4 : index
      %c0_37 = arith.constant 0 : index
      %c0_38 = arith.constant 0 : index
      %66 = vector.load %arg5[%c4_36, %c0_37, %c0_38] : memref<5x8x128xf32, #tpu.memory_space<vmem>>, vector<1x8x128xf32>
      %67 = vector.shape_cast %66 : vector<1x8x128xf32> to vector<8x128xf32>
      %68 = vector.shape_cast %65 : vector<8x128xf32> to vector<1x8x128xf32>
      tpu.vector_store %arg5[%c4_36, %c0_37, %c0_38], %68 {strides = array<i32>} : memref<5x8x128xf32, #tpu.memory_space<vmem>>, vector<1x8x128xf32>,
    } else {
    }
    return
  }
  func.func @transform_0(%arg0: i32, %arg1: i32, %arg2: memref<2xf32, #tpu.memory_space<smem>>) -> (i32, i32) {
    %c1_i32 = arith.constant 1 : i32
    %0 = arith.muli %arg0, %c1_i32 : i32
    %1 = arith.addi %0, %arg1 : i32
    %c0_i32 = arith.constant 0 : i32
    %2 = arith.minsi %1, %c0_i32 : i32
    %c0_i32_0 = arith.constant 0 : i32
    %c0_i32_1 = arith.constant 0 : i32
    return %2, %c0_i32_0 : i32, i32
  }
  func.func @transform_1(%arg0: i32, %arg1: i32, %arg2: memref<2xf32, #tpu.memory_space<smem>>) -> (i32, i32) {
    %c1_i32 = arith.constant 1 : i32
    %0 = arith.muli %arg0, %c1_i32 : i32
    %1 = arith.addi %0, %arg1 : i32
    %c0_i32 = arith.constant 0 : i32
    %2 = arith.minsi %1, %c0_i32 : i32
    %c0_i32_0 = arith.constant 0 : i32
    %c0_i32_1 = arith.constant 0 : i32
    return %2, %c0_i32_0 : i32, i32
  }
  func.func @transform_2(%arg0: i32, %arg1: i32, %arg2: memref<2xf32, #tpu.memory_space<smem>>) -> (i32, i32, i32) {
    %c0_i32 = arith.constant 0 : i32
    %c0_i32_0 = arith.constant 0 : i32
    %c0_i32_1 = arith.constant 0 : i32
    return %arg0, %c0_i32, %c0_i32_0 : i32, i32, i32
  }
}

</mosaic_0001>

<bundles_post_ra>
// kernel: ic_loss.1
= control target key start
LH: loop header
LB: loop body
LE: loop exit
PB: predicated region body
PF: predicated region fallthrough
CT: control target
= control target key end

     0   :  { %s235_s0 = inlined_call_operand.vmem [shape: f32[2], index: 0, kind: input, shape index: {}]   ;;  %s236_s1 = inlined_call_operand.vmem [shape: f32[16,128], index: 1, kind: input, shape index: {}]   ;;  %s237_s2 = inlined_call_operand.vmem [shape: f32[16,128], index: 2, kind: input, shape index: {}]   ;;  %s238_s3 = inlined_call_operand.vmem [shape: f32[5,8,128], index: 3, kind: output, shape index: {}]  }
   0x1   :  { %s8_s14 = sshll.u32 %s235_s0, 4  ;;  %s9_s14 = int_to_ptr.vmem [resolvable:$true] %s8_s14 }
   0x2   :  { %s170_s15 = scalar_lea.vmem %s9_s14, 16  ;;  %p175_p1 = scmp.lt.s32.totalorder %s9_s14, %s9_s14 }
   0x3   :  { %p171_p0 = scmp.ne.s32.totalorder %s9_s14, %s170_s15  ;;  %p176_p2 = scmp.lt.s32.totalorder %s170_s15, %s170_s15 }
   0x5   :  { %p177_p3 = por %p176_p2, %p175_p1 }
   0x7   :  { %p178_p4 = pnand %p177_p3, %p171_p0 }
   0x9   :  { %181 = shalt.err (!%p178_p4)  }
   0xa   :  { %s184_s16 = smov [#allocation3]  }
   0xb   :  { %11 = dma.vmem_to_smem %s9_s14, 16, %s184_s16, [#allocation2] }
   0xc   :  { %182 = dma.done.wait [#allocation2], 16 }
   0xd   :  { %183 = vsyncadd [#allocation2], 4294967280 }
   0xe   :  { %13 = sfence }
   0xf   :  { %s92_s17 = sld [smem:[#allocation3]]  ;;  %s159_s18 = sld [smem:[#allocation3 + $0x1]]  ;;  %v100_v0 = vld [vmem:[%s236_s1] sm:$0xff]  ;;  %v101_v1 = vld [vmem:[%s236_s1 + $0x8] sm:$0xff] }
  0x10   :  { %v104_v2 = vld [vmem:[%s237_s2] sm:$0xff]  ;;  %v105_v3 = vld [vmem:[%s237_s2 + $0x8] sm:$0xff] }
  0x15   :  { %v94_v4 = vstv %s92_s17  ;;  %v95_v7 = vstv %s159_s18 }
  0x16   :  { %v102_v5 = vsub.f32 %v100_v0, %v94_v4  ;;  %v103_v6 = vsub.f32 %v101_v1, %v94_v4  ;;  %v106_v8 = vsub.f32 %v104_v2, %v95_v7  ;;  %v107_v9 = vsub.f32 %v105_v3, %v95_v7 }
  0x18   :  { %v108_v10 = vadd.f32 %v103_v6, %v102_v5  ;;  %v112_v11 = vmul.f32 %v102_v5, %v102_v5  ;;  %v113_v12 = vmul.f32 %v103_v6, %v103_v6  ;;  %v110_v13 = vadd.f32 %v107_v9, %v106_v8 }
  0x19   :  { %v116_v14 = vmul.f32 %v106_v8, %v106_v8  ;;  %v117_v15 = vmul.f32 %v107_v9, %v107_v9  ;;  %v120_v16 = vmul.f32 %v106_v8, %v102_v5  ;;  %v121_v18 = vmul.f32 %v107_v9, %v103_v6 }
  0x1a   :  { %v114_v17 = vadd.f32 %v113_v12, %v112_v11  ;;  %126 = vst [vmem:[%s238_s3] sm:$0xff] %v108_v10  ;;  %161 = vst [vmem:[%s238_s3 + $0x8] sm:$0xff] %v110_v13 }
  0x1b   :  { %v118_v19 = vadd.f32 %v117_v15, %v116_v14  ;;  %v122_v20 = vadd.f32 %v121_v18, %v120_v16 }
  0x1c   :  { %163 = vst [vmem:[%s238_s3 + $0x10] sm:$0xff] %v114_v17 }
  0x1d   :  { %165 = vst [vmem:[%s238_s3 + $0x18] sm:$0xff] %v118_v19  ;;  %167 = vst [vmem:[%s238_s3 + $0x20] sm:$0xff] %v122_v20 }

</bundles_post_ra>
